<compile_context>
chip_gen: v7x
topology: tpu7x:2x2x1
jax: 0.10.0
libtpu: 0.0.40
codegen_flags: <defaults>
</compile_context>

<pallas_src>
import functools

import jax
import jax.numpy as jnp
from jax.experimental import pallas as pl
from jax.experimental.pallas import tpu as pltpu


# ---------------------------------------------------------------------------
# Kernel 1: conv as one MXU matmul per batch item + per-batch BN partial stats.
# ---------------------------------------------------------------------------
def conv_stats_kernel(p_ref, wt_ref, y_ref, psum_ref, psumsq_ref):
    # p_ref:   (1, M, KCp)    bf16  im2col patches for this batch item
    # wt_ref:  (Cout, KCp)    bf16  conv weights, taps folded into contraction
    # y_ref:   (1, Cout, M)   f32   conv output, channel-major (lane-dense M)
    # psum/psumsq: (1, Cout, 1) f32 per-batch partial BatchNorm statistics
    yt = jax.lax.dot_general(
        wt_ref[...], p_ref[0],
        dimension_numbers=(((1,), (1,)), ((), ())),   # contract both last dims
        preferred_element_type=jnp.float32)           # -> (Cout, M), f32 acc
    y_ref[0] = yt
    psum_ref[0] = jnp.sum(yt, axis=1, keepdims=True)          # (Cout, 1)
    psumsq_ref[0] = jnp.sum(yt * yt, axis=1, keepdims=True)   # (Cout, 1)


# ---------------------------------------------------------------------------
# Kernel 2: fused BatchNorm affine (precomputed scale/shift) + LeakyReLU.
# ---------------------------------------------------------------------------
def bn_lrelu_kernel(y_ref, scale_ref, shift_ref, o_ref, *, negative_slope):
    # y_ref: (1, Cout, M); scale/shift: (Cout, 1) broadcast across lanes (M)
    z = y_ref[0] * scale_ref[...] + shift_ref[...]
    o_ref[0] = jnp.where(z >= 0, z, negative_slope * z)


# ---------------------------------------------------------------------------
# Wrapper: layout glue, im2col, per-channel scalar math, pallas_call plumbing.
# ---------------------------------------------------------------------------
def conv_block_forward(x_ncdhw, w_oidhw, gamma, beta,
                       eps=1e-5, negative_slope=0.01):
    N, Cin, D, H, W = x_ncdhw.shape
    Cout, _, K, _, _ = w_oidhw.shape
    pad = (K - 1) // 2
    M = D * H * W
    KC = K * K * K * Cin
    KCp = ((KC + 127) // 128) * 128          # pad contraction dim to 128 lanes

    # ---- wrapper glue (XLA): single small transpose + pad + im2col ---------
    x = jnp.transpose(x_ncdhw, (0, 2, 3, 4, 1)).astype(jnp.bfloat16)  # NDHWC
    xp = jnp.pad(x, ((0, 0), (pad, pad), (pad, pad), (pad, pad), (0, 0)))

    taps = [xp[:, kd:kd + D, kh:kh + H, kw:kw + W, :]
            for kd in range(K) for kh in range(K) for kw in range(K)]
    patches = jnp.concatenate(taps, axis=-1).reshape(N, M, KC)
    patches = jnp.pad(patches, ((0, 0), (0, 0), (0, KCp - KC)))      # zeros

    # OIDHW -> (Cout, kd, kh, kw, Cin) -> (Cout, K^3*Cin), matching tap order.
    wt = jnp.transpose(w_oidhw, (0, 2, 3, 4, 1)).reshape(Cout, KC)
    wt = jnp.pad(wt, ((0, 0), (0, KCp - KC))).astype(jnp.bfloat16)

    # NOTE: for realistic volumes, add a second grid axis tiling M (D*H*W) so
    # each (TM, KCp) / (Cout, TM) block fits v7x's smaller VMEM; trivial here.
    y, psum, psumsq = pl.pallas_call(
        conv_stats_kernel,
        grid=(N,),
        in_specs=[
            pl.BlockSpec((1, M, KCp), lambda n: (n, 0, 0)),
            pl.BlockSpec((Cout, KCp), lambda n: (0, 0)),
        ],
        out_specs=(
            pl.BlockSpec((1, Cout, M), lambda n: (n, 0, 0)),
            pl.BlockSpec((1, Cout, 1), lambda n: (n, 0, 0)),
            pl.BlockSpec((1, Cout, 1), lambda n: (n, 0, 0)),
        ),
        out_shape=(
            jax.ShapeDtypeStruct((N, Cout, M), jnp.float32),
            jax.ShapeDtypeStruct((N, Cout, 1), jnp.float32),
            jax.ShapeDtypeStruct((N, Cout, 1), jnp.float32),
        ),
        compiler_params=pltpu.CompilerParams(
            dimension_semantics=("parallel",)),
    )(patches, wt)

    # ---- tiny per-channel scalar math: batch stats -> BN scale/shift -------
    count = N * M
    mean = jnp.sum(psum[:, :, 0], axis=0) / count
    var = jnp.sum(psumsq[:, :, 0], axis=0) / count - mean * mean   # biased (train)
    scale = gamma / jnp.sqrt(var + eps)
    shift = beta - mean * scale

    out = pl.pallas_call(
        functools.partial(bn_lrelu_kernel, negative_slope=negative_slope),
        grid=(N,),
        in_specs=[
            pl.BlockSpec((1, Cout, M), lambda n: (n, 0, 0)),
            pl.BlockSpec((Cout, 1), lambda n: (0, 0)),
            pl.BlockSpec((Cout, 1), lambda n: (0, 0)),
        ],
        out_specs=pl.BlockSpec((1, Cout, M), lambda n: (n, 0, 0)),
        out_shape=jax.ShapeDtypeStruct((N, Cout, M), jnp.float32),
        input_output_aliases={0: 0},          # normalize y in place (mem-bound)
        compiler_params=pltpu.CompilerParams(
            dimension_semantics=("parallel",)),
    )(y, scale.reshape(Cout, 1), shift.reshape(Cout, 1))

    # Channel-major kernel layout (N, Cout, D*H*W) is already NC(DHW):
    # the output reshape back to NCDHW is free (no transpose pass).
    return out.reshape(N, Cout, D, H, W)


# ---------------------------------------------------------------------------
# Pure-JAX reference (for correctness check only).
# ---------------------------------------------------------------------------
def reference_forward(x, w, gamma, beta, eps=1e-5, negative_slope=0.01,
                      conv_dtype=jnp.float32):
    pad = (w.shape[2] - 1) // 2
    y = jax.lax.conv_general_dilated(
        x.astype(conv_dtype), w.astype(conv_dtype),
        window_strides=(1, 1, 1),
        padding=((pad, pad),) * 3,
        dimension_numbers=("NCDHW", "OIDHW", "NCDHW"),
        preferred_element_type=jnp.float32)
    mean = y.mean(axis=(0, 2, 3, 4), keepdims=True)
    var = ((y - mean) ** 2).mean(axis=(0, 2, 3, 4), keepdims=True)
    yhat = (y - mean) / jnp.sqrt(var + eps)
    z = yhat * gamma.reshape(1, -1, 1, 1, 1) + beta.reshape(1, -1, 1, 1, 1)
    return jnp.where(z >= 0, z, negative_slope * z)


if __name__ == "__main__":
    # Small deterministic shapes: batch=2, Cin=4, Cout=8, spatial 8x8x8.
    N, Cin, Cout, D, H, W, K = 2, 4, 8, 8, 8, 8, 3

    key = jax.random.PRNGKey(0)
    kx, kw = jax.random.split(key)

    x = jax.random.normal(kx, (N, Cin, D, H, W), dtype=jnp.float32)
    fan_in = Cin * K * K * K
    bound = 1.0 / (fan_in ** 0.5)               # Conv3d-like kaiming-uniform bound
    w = jax.random.uniform(kw, (Cout, Cin, K, K, K),
                           minval=-bound, maxval=bound, dtype=jnp.float32)
    gamma = jnp.ones((Cout,), dtype=jnp.float32)   # BatchNorm3d default weight
    beta = jnp.zeros((Cout,), dtype=jnp.float32)   # BatchNorm3d default bias

    fwd = jax.jit(conv_block_forward)
    out = jax.block_until_ready(fwd(x, w, gamma, beta))
    assert out.shape == (N, Cout, D, H, W)

    # Tight check vs a reference using the same bf16 matmul inputs / f32 accum.
    ref_bf16 = reference_forward(x, w, gamma, beta, conv_dtype=jnp.bfloat16)
    assert jnp.allclose(out, ref_bf16, atol=2e-3, rtol=2e-3), \
        "mismatch vs bf16-precision JAX reference"

    # Looser check vs the pure-f32 PyTorch-equivalent reference (bf16 MXU
    # operands introduce ~1e-3-level error post-BatchNorm).
    ref_f32 = reference_forward(x, w, gamma, beta, conv_dtype=jnp.float32)
    assert jnp.allclose(out, ref_f32, atol=5e-2, rtol=5e-2), \
        "mismatch vs f32 JAX reference"

    print("KERNEL_OK")
</pallas_src>

<mosaic_0001>
module attributes {stable_mosaic.version = 11 : i64} {
  func.func @conv_stats_kernel(%arg0: i32, %arg1: memref<1x512x128xbf16, #tpu.memory_space<vmem>>, %arg2: memref<8x128xbf16, #tpu.memory_space<vmem>>, %arg3: memref<1x8x512xf32, #tpu.memory_space<vmem>>, %arg4: memref<1x8x1xf32, #tpu.memory_space<vmem>>, %arg5: memref<1x8x1xf32, #tpu.memory_space<vmem>>) attributes {dimension_semantics = [#tpu.dimension_semantics<parallel>], iteration_bounds = array<i64: 2>, scalar_prefetch = 0 : i64, scratch_operands = 0 : i64, tpu.core_type = #tpu.core_type<tc>, window_params = [{transform_indices = @transform_0, window_bounds = array<i64: 1, 512, 128>}, {pipeline_mode = #tpu.pipeline_mode<synchronous>, transform_indices = @transform_1, window_bounds = array<i64: 8, 128>}, {transform_indices = @transform_2, window_bounds = array<i64: 1, 8, 512>}, {transform_indices = @transform_3, window_bounds = array<i64: 1, 8, 1>}, {transform_indices = @transform_4, window_bounds = array<i64: 1, 8, 1>}]} {
    %c0 = arith.constant 0 : index
    %c0_0 = arith.constant 0 : index
    %0 = vector.load %arg2[%c0, %c0_0] : memref<8x128xbf16, #tpu.memory_space<vmem>>, vector<8x128xbf16>
    %c0_1 = arith.constant 0 : index
    %c0_2 = arith.constant 0 : index
    %c0_3 = arith.constant 0 : index
    %1 = vector.load %arg1[%c0_1, %c0_2, %c0_3] : memref<1x512x128xbf16, #tpu.memory_space<vmem>>, vector<1x512x128xbf16>
    %2 = vector.shape_cast %1 : vector<1x512x128xbf16> to vector<512x128xbf16>
    %cst = arith.constant dense<0.000000e+00> : vector<8x512xf32>
    %3 = tpu.matmul %0, %2, %cst {dimension_numbers = #tpu.dot_dimension_numbers<[1], [1], [0], [0], [0, 0, 1, 0], [], []>} : vector<8x128xbf16>, vector<512x128xbf16>, vector<8x512xf32> -> vector<8x512xf32>
    %c0_4 = arith.constant 0 : index
    %c0_5 = arith.constant 0 : index
    %c0_6 = arith.constant 0 : index
    %4 = vector.load %arg3[%c0_4, %c0_5, %c0_6] : memref<1x8x512xf32, #tpu.memory_space<vmem>>, vector<1x8x512xf32>
    %5 = vector.shape_cast %4 : vector<1x8x512xf32> to vector<8x512xf32>
    %6 = vector.shape_cast %3 : vector<8x512xf32> to vector<1x8x512xf32>
    tpu.vector_store %arg3[%c0_4, %c0_5, %c0_6], %6 {strides = array<i32>} : memref<1x8x512xf32, #tpu.memory_space<vmem>>, vector<1x8x512xf32>,
    %cst_7 = arith.constant dense<0.000000e+00> : vector<8xf32>
    %7 = vector.multi_reduction <add>, %3, %cst_7 [1] : vector<8x512xf32> to vector<8xf32>
    %8 = vector.shape_cast %7 : vector<8xf32> to vector<8x1xf32>
    %c0_8 = arith.constant 0 : index
    %c0_9 = arith.constant 0 : index
    %c0_10 = arith.constant 0 : index
    %9 = vector.load %arg4[%c0_8, %c0_9, %c0_10] : memref<1x8x1xf32, #tpu.memory_space<vmem>>, vector<1x8x1xf32>
    %10 = vector.shape_cast %9 : vector<1x8x1xf32> to vector<8x1xf32>
    %11 = vector.shape_cast %8 : vector<8x1xf32> to vector<1x8x1xf32>
    tpu.vector_store %arg4[%c0_8, %c0_9, %c0_10], %11 {strides = array<i32>} : memref<1x8x1xf32, #tpu.memory_space<vmem>>, vector<1x8x1xf32>,
    %12 = arith.mulf %3, %3 : vector<8x512xf32>
    %cst_11 = arith.constant dense<0.000000e+00> : vector<8xf32>
    %13 = vector.multi_reduction <add>, %12, %cst_11 [1] : vector<8x512xf32> to vector<8xf32>
    %14 = vector.shape_cast %13 : vector<8xf32> to vector<8x1xf32>
    %c0_12 = arith.constant 0 : index
    %c0_13 = arith.constant 0 : index
    %c0_14 = arith.constant 0 : index
    %15 = vector.load %arg5[%c0_12, %c0_13, %c0_14] : memref<1x8x1xf32, #tpu.memory_space<vmem>>, vector<1x8x1xf32>
    %16 = vector.shape_cast %15 : vector<1x8x1xf32> to vector<8x1xf32>
    %17 = vector.shape_cast %14 : vector<8x1xf32> to vector<1x8x1xf32>
    tpu.vector_store %arg5[%c0_12, %c0_13, %c0_14], %17 {strides = array<i32>} : memref<1x8x1xf32, #tpu.memory_space<vmem>>, vector<1x8x1xf32>,
    return
  }
  func.func @transform_0(%arg0: i32) -> (i32, i32, i32) {
    %c0_i32 = arith.constant 0 : i32
    %c0_i32_0 = arith.constant 0 : i32
    %c0_i32_1 = arith.constant 0 : i32
    return %arg0, %c0_i32, %c0_i32_0 : i32, i32, i32
  }
  func.func @transform_1(%arg0: i32) -> (i32, i32) {
    %c0_i32 = arith.constant 0 : i32
    %c0_i32_0 = arith.constant 0 : i32
    %c0_i32_1 = arith.constant 0 : i32
    return %c0_i32, %c0_i32_0 : i32, i32
  }
  func.func @transform_2(%arg0: i32) -> (i32, i32, i32) {
    %c0_i32 = arith.constant 0 : i32
    %c0_i32_0 = arith.constant 0 : i32
    %c0_i32_1 = arith.constant 0 : i32
    return %arg0, %c0_i32, %c0_i32_0 : i32, i32, i32
  }
  func.func @transform_3(%arg0: i32) -> (i32, i32, i32) {
    %c0_i32 = arith.constant 0 : i32
    %c0_i32_0 = arith.constant 0 : i32
    %c0_i32_1 = arith.constant 0 : i32
    return %arg0, %c0_i32, %c0_i32_0 : i32, i32, i32
  }
  func.func @transform_4(%arg0: i32) -> (i32, i32, i32) {
    %c0_i32 = arith.constant 0 : i32
    %c0_i32_0 = arith.constant 0 : i32
    %c0_i32_1 = arith.constant 0 : i32
    return %arg0, %c0_i32, %c0_i32_0 : i32, i32, i32
  }
}

module attributes {stable_mosaic.version = 11 : i64} {
  func.func @bn_lrelu_kernel(%arg0: i32, %arg1: memref<1x8x512xf32, #tpu.memory_space<vmem>>, %arg2: memref<8x1xf32, #tpu.memory_space<vmem>>, %arg3: memref<8x1xf32, #tpu.memory_space<vmem>>, %arg4: memref<1x8x512xf32, #tpu.memory_space<vmem>>) attributes {dimension_semantics = [#tpu.dimension_semantics<parallel>], iteration_bounds = array<i64: 2>, scalar_prefetch = 0 : i64, scratch_operands = 0 : i64, tpu.core_type = #tpu.core_type<tc>, window_params = [{transform_indices = @transform_0, window_bounds = array<i64: 1, 8, 512>}, {pipeline_mode = #tpu.pipeline_mode<synchronous>, transform_indices = @transform_1, window_bounds = array<i64: 8, 1>}, {pipeline_mode = #tpu.pipeline_mode<synchronous>, transform_indices = @transform_2, window_bounds = array<i64: 8, 1>}, {transform_indices = @transform_3, window_bounds = array<i64: 1, 8, 512>}]} {
    %c0 = arith.constant 0 : index
    %c0_0 = arith.constant 0 : index
    %c0_1 = arith.constant 0 : index
    %0 = vector.load %arg1[%c0, %c0_0, %c0_1] : memref<1x8x512xf32, #tpu.memory_space<vmem>>, vector<1x8x512xf32>
    %1 = vector.shape_cast %0 : vector<1x8x512xf32> to vector<8x512xf32>
    %c0_2 = arith.constant 0 : index
    %c0_3 = arith.constant 0 : index
    %2 = vector.load %arg2[%c0_2, %c0_3] : memref<8x1xf32, #tpu.memory_space<vmem>>, vector<8x1xf32>
    %3 = vector.broadcast %2 : vector<8x1xf32> to vector<8x512xf32>
    %4 = arith.mulf %1, %3 : vector<8x512xf32>
    %c0_4 = arith.constant 0 : index
    %c0_5 = arith.constant 0 : index
    %5 = vector.load %arg3[%c0_4, %c0_5] : memref<8x1xf32, #tpu.memory_space<vmem>>, vector<8x1xf32>
    %6 = vector.broadcast %5 : vector<8x1xf32> to vector<8x512xf32>
    %7 = arith.addf %4, %6 : vector<8x512xf32>
    %cst = arith.constant 0.000000e+00 : f32
    %8 = vector.broadcast %cst : f32 to vector<8x512xf32>
    %9 = arith.cmpf oge, %7, %8 : vector<8x512xf32>
    %cst_6 = arith.constant 0.00999999977 : f32
    %10 = vector.broadcast %cst_6 : f32 to vector<8x512xf32>
    %11 = arith.mulf %10, %7 : vector<8x512xf32>
    %12 = arith.select %9, %7, %11 : vector<8x512xi1>, vector<8x512xf32>
    %c0_7 = arith.constant 0 : index
    %c0_8 = arith.constant 0 : index
    %c0_9 = arith.constant 0 : index
    %13 = vector.load %arg4[%c0_7, %c0_8, %c0_9] : memref<1x8x512xf32, #tpu.memory_space<vmem>>, vector<1x8x512xf32>
    %14 = vector.shape_cast %13 : vector<1x8x512xf32> to vector<8x512xf32>
    %15 = vector.shape_cast %12 : vector<8x512xf32> to vector<1x8x512xf32>
    tpu.vector_store %arg4[%c0_7, %c0_8, %c0_9], %15 {strides = array<i32>} : memref<1x8x512xf32, #tpu.memory_space<vmem>>, vector<1x8x512xf32>,
    return
  }
  func.func @transform_0(%arg0: i32) -> (i32, i32, i32) {
    %c0_i32 = arith.constant 0 : i32
    %c0_i32_0 = arith.constant 0 : i32
    %c0_i32_1 = arith.constant 0 : i32
    return %arg0, %c0_i32, %c0_i32_0 : i32, i32, i32
  }
  func.func @transform_1(%arg0: i32) -> (i32, i32) {
    %c0_i32 = arith.constant 0 : i32
    %c0_i32_0 = arith.constant 0 : i32
    %c0_i32_1 = arith.constant 0 : i32
    return %c0_i32, %c0_i32_0 : i32, i32
  }
  func.func @transform_2(%arg0: i32) -> (i32, i32) {
    %c0_i32 = arith.constant 0 : i32
    %c0_i32_0 = arith.constant 0 : i32
    %c0_i32_1 = arith.constant 0 : i32
    return %c0_i32, %c0_i32_0 : i32, i32
  }
  func.func @transform_3(%arg0: i32) -> (i32, i32, i32) {
    %c0_i32 = arith.constant 0 : i32
    %c0_i32_0 = arith.constant 0 : i32
    %c0_i32_1 = arith.constant 0 : i32
    return %arg0, %c0_i32, %c0_i32_0 : i32, i32, i32
  }
}

</mosaic_0001>

<bundles_post_ra>
// kernel: conv_block_forward.3
= control target key start
LH: loop header
LB: loop body
LE: loop exit
PB: predicated region body
PF: predicated region fallthrough
CT: control target
= control target key end

     0   :  { %s318_s12 = smov 0   ;;  %s341_s0 = inlined_call_operand.vmem [shape: f32[2,8,512], index: 0, kind: input, shape index: {}, may-alias: {0,3}]   ;;  %s342_s1 = inlined_call_operand.vmem [shape: f32[8,1], index: 1, kind: input, shape index: {}]   ;;  %s343_s2 = inlined_call_operand.vmem [shape: f32[8,1], index: 2, kind: input, shape index: {}]   ;;  %s344_s3 = inlined_call_operand.vmem [shape: f32[2,8,512], index: 3, kind: output, shape index: {}, may-alias: {0,3}]  }
   0x1 LB: > { %s266_s13 = sadd.s32 4294967295, %s295_s12   ;;  %p270_p0 = scmp.ge.s32.totalorder %s295_s12, 1  ;;  %s295_s12 = sphi %s318_s12, %s13_s12  }
   0x2   : > { %p137_p1 = scmp.lt.s32.totalorder %s295_s12, 3 }
   0x4   : > { %p138_p2 = pnand %p270_p0, %p137_p1 }
   0x5   : > { %v175_v0 = vld [vmem:[%s342_s1] sm:$0xff] (!%p138_p2)  ;;  %v297_v1 = vmov (!%p138_p2), 0   ;;  %p161_p3 = scmp.lt.s32.totalorder (!%p138_p2), %s266_s13, 1 }
   0x6   : > { %141 = sbr.rel (%p138_p2) target bundleno = 147 (0x93), region = 32  ;;  %288 = vset.pattern.permute.xlu0 (!%p138_p2), %v297_v1  ;;  %v185_v2 = vld [vmem:[%s343_s2] sm:$0xff] (!%p138_p2) }
   0x7   : > { %178 = vperm.xlu0 (!%p138_p2), %288, %v175_v0  }
   0xb   : > { %188 = vperm.xlu0 (!%p138_p2), %288, %v185_v2  }
   0xd   : > { %s346_s13 = smov (!%p161_p3, %s266_s13), 1 }
   0xe   : > { %s277_s18 = sshll.u32 %s346_s13, 5 }
   0xf   : > { %s165_s21 = scalar_lea.vmem %s341_s0, %s277_s18  ;;  %s170_s24 = scalar_lea.vmem %s344_s3, %s277_s18 }
  0x10   : > { %v171_v3 = vld [vmem:[%s165_s21] sm:$0xff]  ;;  %v172_v5 = vld [vmem:[%s165_s21 + $0x8] sm:$0xff]  ;;  %v173_v6 = vld [vmem:[%s165_s21 + $0x10] sm:$0xff] }
  0x11   : > { %v174_v7 = vld [vmem:[%s165_s21 + $0x18] sm:$0xff] }
  0x86   : > { %v179_v4 = vpop.permute.xlu0 %178 }
  0x87   : > { %v181_v8 = vmul.f32 %v179_v4, %v171_v3  ;;  %v182_v9 = vmul.f32 %v179_v4, %v172_v5  ;;  %v183_v10 = vmul.f32 %v179_v4, %v173_v6  ;;  %v184_v11 = vmul.f32 %v179_v4, %v174_v7 }
  0x8a   : > { %v189_v12 = vpop.permute.xlu0 %188 }
  0x8b   : > { %v191_v13 = vadd.f32 %v189_v12, %v181_v8  ;;  %v192_v14 = vadd.f32 %v189_v12, %v182_v9  ;;  %v193_v15 = vadd.f32 %v189_v12, %v183_v10  ;;  %v194_v16 = vadd.f32 %v189_v12, %v184_v11 }
  0x8d   : > { %vm195_vm0 = vcmp.ge.f32.partialorder %v191_v13, 0.0  ;;  %vm196_vm1 = vcmp.ge.f32.partialorder %v192_v14, 0.0  ;;  %vm197_vm2 = vcmp.ge.f32.partialorder %v193_v15, 0.0  ;;  %vm198_vm3 = vcmp.ge.f32.partialorder %v194_v16, 0.0 }
  0x8e   : > { %v199_v17 = vmul.f32 0.01, %v191_v13  ;;  %v200_v18 = vmul.f32 0.01, %v192_v14  ;;  %v201_v19 = vmul.f32 0.01, %v193_v15 }
  0x8f   : > { %v202_v20 = vmul.f32 0.01, %v194_v16 }
  0x90   : > { %v203_v21 = vsel %vm195_vm0, %v191_v13, %v199_v17  ;;  %v204_v22 = vsel %vm196_vm1, %v192_v14, %v200_v18  ;;  %v205_v23 = vsel %vm197_vm2, %v193_v15, %v201_v19 }
  0x91   : > { %v206_v24 = vsel %vm198_vm3, %v194_v16, %v202_v20  ;;  %207 = vst [vmem:[%s170_s24] sm:$0xff] %v203_v21  ;;  %208 = vst [vmem:[%s170_s24 + $0x8] sm:$0xff] %v204_v22 }
  0x92   : > { %209 = vst [vmem:[%s170_s24 + $0x10] sm:$0xff] %v205_v23  ;;  %210 = vst [vmem:[%s170_s24 + $0x18] sm:$0xff] %v206_v24 }
  0x93 PF: > { %s13_s12 = sadd.s32 1, %s295_s12  }
  0x94   : > { %p10_p4 = scmp.ge.s32.totalorder %s13_s12, 4  }
  0x96   :  { %12 = sbr.rel (!%p10_p4) target bundleno = 1 (0x1), region = 62 }

// kernel: conv_block_forward.2
= control target key start
LH: loop header
LB: loop body
LE: loop exit
PB: predicated region body
PF: predicated region fallthrough
CT: control target
= control target key end

     0   :  { %s853_s15 = smov 0   ;;  %s924_s0 = inlined_call_operand.vmem [shape: bf16[2,512,128], index: 0, kind: input, shape index: {}]   ;;  %s925_s1 = inlined_call_operand.vmem [shape: bf16[8,128], index: 1, kind: input, shape index: {}]   ;;  %s926_s2 = inlined_call_operand.vmem [shape: f32[2,8,512], index: 2, kind: output, shape index: {0}]   ;;  %s927_s3 = inlined_call_operand.vmem [shape: f32[2,8,1], index: 3, kind: output, shape index: {1}]   ;;  %s928_s4 = inlined_call_operand.vmem [shape: f32[2,8,1], index: 4, kind: output, shape index: {2}]  }
   0x1 LB: > { %s697_s16 = sadd.s32 4294967295, %s826_s15   ;;  %p701_p0 = scmp.ge.s32.totalorder %s826_s15, 1  ;;  %s826_s15 = sphi %s853_s15, %s15_s15  }
   0x2   : > { %p167_p1 = scmp.lt.s32.totalorder %s826_s15, 3 }
   0x4   : > { %p168_p2 = pnand %p701_p0, %p167_p1 }
   0x5   : > { %p201_p3 = scmp.lt.s32.totalorder (!%p168_p2), %s697_s16, 1  ;;  %v864_v0 = vld [vmem:[%s925_s1] sm:$0xf] (!%p168_p2)  ;;  %vm568_vm0 = vcmask (!%p168_p2), 7168  }
   0x6   : > { %171 = sbr.rel (%p168_p2) target bundleno = 448 (0x1c0), region = 28  ;;  %760 = vmatprep.mubr.bf16.mxu0 (!%p168_p2), %v864_v0  ;;  %778 = vmatprep.mubr.bf16.mxu1 (!%p168_p2), %v864_v0 }
   0xd   : > { %s930_s16 = smov (!%p201_p3, %s697_s16), 1 }
   0xe   : > { %s742_s19 = sshll.u32 %s930_s16, 8  ;;  %s743_s23 = sshll.u32 %s930_s16, 5 }
   0xf   : > { %s874_s22 = scalar_lea.vmem %s924_s0, %s742_s19  ;;  %s210_s26 = scalar_lea.vmem %s926_s2, %s743_s23 }
  0x10   : > { %v788_v1 = vld [vmem:[%s874_s22 + $0x40] sm:$0xff]   ;;  %v792_v5 = vld [vmem:[%s874_s22 + $0x48] sm:$0xff]   ;;  %v796_v9 = vld [vmem:[%s874_s22 + $0x50] sm:$0xff]   ;;  %s706_s27 = sshll.u32 %s930_s16, 3 }
  0x11   : > { %v789_v2 = vld [vmem:[%s874_s22 + $0xc0] sm:$0xff]   ;;  %744 = vmatprep.subr.bf16.mxu0 %v788_v1  ;;  %v793_v6 = vld [vmem:[%s874_s22 + $0xc8] sm:$0xff]   ;;  %v797_v10 = vld [vmem:[%s874_s22 + $0xd0] sm:$0xff]   ;;  %s214_s30 = scalar_lea.vmem %s927_s3, %s706_s27  ;;  %s218_s7 = scalar_lea.vmem %s928_s4, %s706_s27 }
  0x12   : > { %v790_v3 = vld [vmem:[%s874_s22] sm:$0xff]   ;;  %762 = vmatprep.subr.bf16.mxu1 %v789_v2  ;;  %v794_v7 = vld [vmem:[%s874_s22 + $0x8] sm:$0xff]   ;;  %v798_v11 = vld [vmem:[%s874_s22 + $0x10] sm:$0xff]  }
  0x13   : > { %v791_v4 = vld [vmem:[%s874_s22 + $0x80] sm:$0xff]   ;;  %745 = vmatpush3.bf16.xpose.msra.mxu0 %v790_v3  ;;  %v795_v8 = vld [vmem:[%s874_s22 + $0x88] sm:$0xff]   ;;  %v799_v12 = vld [vmem:[%s874_s22 + $0x90] sm:$0xff]  }
  0x14   : > { %763 = vmatpush3.bf16.xpose.msra.mxu1 %v791_v4  ;;  %746 = vmatprep.subr.bf16.mxu0 %v792_v5  ;;  %v800_v13 = vld [vmem:[%s874_s22 + $0x58] sm:$0xff]   ;;  %v804_v17 = vld [vmem:[%s874_s22 + $0x60] sm:$0xff]   ;;  %v808_v21 = vld [vmem:[%s874_s22 + $0x68] sm:$0xff]  }
  0x15   : > { %764 = vmatprep.subr.bf16.mxu1 %v793_v6  ;;  %v801_v14 = vld [vmem:[%s874_s22 + $0xd8] sm:$0xff]   ;;  %v805_v18 = vld [vmem:[%s874_s22 + $0xe0] sm:$0xff]   ;;  %v809_v22 = vld [vmem:[%s874_s22 + $0xe8] sm:$0xff]  }
  0x16   : > { %v802_v15 = vld [vmem:[%s874_s22 + $0x18] sm:$0xff]   ;;  %v806_v19 = vld [vmem:[%s874_s22 + $0x20] sm:$0xff]   ;;  %v810_v23 = vld [vmem:[%s874_s22 + $0x28] sm:$0xff]  }
  0x17   : > { %v803_v16 = vld [vmem:[%s874_s22 + $0x98] sm:$0xff]   ;;  %v807_v20 = vld [vmem:[%s874_s22 + $0xa0] sm:$0xff]   ;;  %v811_v24 = vld [vmem:[%s874_s22 + $0xa8] sm:$0xff]  }
  0x18   : > { %v812_v25 = vld [vmem:[%s874_s22 + $0x70] sm:$0xff]   ;;  %v816_v29 = vld [vmem:[%s874_s22 + $0x78] sm:$0xff]  }
  0x19   : > { %v813_v26 = vld [vmem:[%s874_s22 + $0xf0] sm:$0xff]   ;;  %v817_v30 = vld [vmem:[%s874_s22 + $0xf8] sm:$0xff]  }
  0x1a   : > { %v814_v27 = vld [vmem:[%s874_s22 + $0x30] sm:$0xff]   ;;  %v818_v31 = vld [vmem:[%s874_s22 + $0x38] sm:$0xff]  }
  0x1b   : > { %747 = vmatpush3.bf16.xpose.msra.mxu0 %v794_v7  ;;  %v815_v28 = vld [vmem:[%s874_s22 + $0xb0] sm:$0xff]   ;;  %v819_v32 = vld [vmem:[%s874_s22 + $0xb8] sm:$0xff]  }
  0x1c   : > { %765 = vmatpush3.bf16.xpose.msra.mxu1 %v795_v8  ;;  %748 = vmatprep.subr.bf16.mxu0 %v796_v9 }
  0x1d   : > { %766 = vmatprep.subr.bf16.mxu1 %v797_v10 }
  0x23   : > { %749 = vmatpush3.bf16.xpose.msra.mxu0 %v798_v11 }
  0x24   : > { %767 = vmatpush3.bf16.xpose.msra.mxu1 %v799_v12  ;;  %750 = vmatprep.subr.bf16.mxu0 %v800_v13 }
  0x25   : > { %768 = vmatprep.subr.bf16.mxu1 %v801_v14 }
  0x2b   : > { %751 = vmatpush3.bf16.xpose.msra.mxu0 %v802_v15 }
  0x2c   : > { %769 = vmatpush3.bf16.xpose.msra.mxu1 %v803_v16  ;;  %752 = vmatprep.subr.bf16.mxu0 %v804_v17 }
  0x2d   : > { %770 = vmatprep.subr.bf16.mxu1 %v805_v18 }
  0x33   : > { %753 = vmatpush3.bf16.xpose.msra.mxu0 %v806_v19 }
  0x34   : > { %771 = vmatpush3.bf16.xpose.msra.mxu1 %v807_v20  ;;  %754 = vmatprep.subr.bf16.mxu0 %v808_v21 }
  0x35   : > { %772 = vmatprep.subr.bf16.mxu1 %v809_v22 }
  0x3b   : > { %755 = vmatpush3.bf16.xpose.msra.mxu0 %v810_v23 }
  0x3c   : > { %773 = vmatpush3.bf16.xpose.msra.mxu1 %v811_v24  ;;  %756 = vmatprep.subr.bf16.mxu0 %v812_v25 }
  0x3d   : > { %774 = vmatprep.subr.bf16.mxu1 %v813_v26 }
  0x43   : > { %757 = vmatpush3.bf16.xpose.msra.mxu0 %v814_v27 }
  0x44   : > { %775 = vmatpush3.bf16.xpose.msra.mxu1 %v815_v28  ;;  %758 = vmatprep.subr.bf16.mxu0 %v816_v29 }
  0x45   : > { %776 = vmatprep.subr.bf16.mxu1 %v817_v30 }
  0x4b   : > { %759 = vmatpush3.bf16.xpose.msra.mxu0 %v818_v31 }
  0x4c   : > { %777 = vmatpush3.bf16.xpose.msra.mxu1 %v819_v32 }
  0x52   : > { %761 = vmatmul.mubr.bf16.vlgmr.msra.gmra.mrb[0].mxu0 %v864_v0 }
  0x53   : > { %779 = vmatmul.mubr.bf16.vlgmr.msra.gmra.mrb[0].mxu1 %v864_v0 }
 0x125   : > { %v511_v33 = vpop.f32.mrb[0].mxu0 }
 0x126   : > { %559 = vst [vmem:[%s210_s26] sm:$0xff] %v511_v33  ;;  %v570_v34 = vmul.f32 %v511_v33, %v511_v33  ;;  %v552_v35 = vpop.f32.mrb[0].mxu1  ;;  %v513_v36 = vpop.f32.mrb[1].mxu0 }
 0x127   : > { %561 = vst [vmem:[%s210_s26 + $0x10] sm:$0xff] %v552_v35  ;;  %v572_v37 = vmul.f32 %v552_v35, %v552_v35  ;;  %560 = vst [vmem:[%s210_s26 + $0x8] sm:$0xff] %v513_v36  ;;  %v563_v38 = vadd.f32 %v513_v36, %v511_v33  ;;  %v571_v39 = vmul.f32 %v513_v36, %v513_v36  ;;  %v554_v40 = vpop.f32.mrb[1].mxu1  ;;  %v515_v41 = vpop.f32.mrb[2].mxu0 }
 0x128   : > { %562 = vst [vmem:[%s210_s26 + $0x18] sm:$0xff] %v554_v40  ;;  %v556_v42 = vpop.f32.mrb[2].mxu1  ;;  %v516_v43 = vpop.f32.mrb[3].mxu0  ;;  %v573_v48 = vmul.f32 %v554_v40, %v554_v40 }
 0x129   : > { %v557_v44 = vpop.f32.mrb[3].mxu1  ;;  %v564_v45 = vadd.f32 %v563_v38, %v552_v35  ;;  %v574_v46 = vadd.f32 %v571_v39, %v570_v34 }
 0x12b   : > { %v565_v47 = vadd.f32 %v564_v45, %v554_v40  ;;  %v575_v49 = vadd.f32 %v574_v46, %v572_v37 }
 0x12d   : > { %566 = vadd.xlane.f32.xlu0 %v565_v47  ;;  %v576_v50 = vadd.f32 %v575_v49, %v573_v48 }
 0x131   : > { %577 = vadd.xlane.f32.xlu0 %v576_v50 }
 0x1ba   : > { %v567_v51 = vpop.xlane.xlu0 %566 }
 0x1bb   : > { %569 = vst.msk [vmem:[%s214_s30] sm:$0xff] %vm568_vm0, %v567_v51 }
 0x1be   : > { %v578_v52 = vpop.xlane.xlu0 %577 }
 0x1bf   : > { %579 = vst.msk [vmem:[%s218_s7] sm:$0xff] %vm568_vm0, %v578_v52 }
 0x1c0 PF: > { %s15_s15 = sadd.s32 1, %s826_s15  }
 0x1c1   : > { %p12_p4 = scmp.ge.s32.totalorder %s15_s15, 4  }
 0x1c3   :  { %14 = sbr.rel (!%p12_p4) target bundleno = 1 (0x1), region = 82 }

</bundles_post_ra>
